<compile_context>
chip_gen: v7x
topology: tpu7x:2x2x1
jax: 0.10.0
libtpu: 0.0.40
codegen_flags: <defaults>
</compile_context>

<pallas_src>
import functools
import math

import jax
import jax.numpy as jnp
from jax.experimental import pallas as pl
from jax.experimental.pallas import tpu as pltpu


def _round_up(x, m):
    return ((x + m - 1) // m) * m


# ----------------------------- glue (plain JAX) ------------------------------
def get_angle(x):
    # x: (B, 2) float32 -> (B, 1) angle in degrees, mod 360.
    # arctan2(b[:,0], b[:,1]) mirrors torch.atan2(b[:,0], b[:,1]) exactly.
    center = jnp.array([[1920.0 / 2.0, 1080.0 / 2.0]], dtype=jnp.float32)
    right = jnp.array([[1920.0, 1080.0 / 2.0]], dtype=jnp.float32)
    a = right - center
    b = x - center
    a = a / jnp.linalg.norm(a, axis=1, keepdims=True)
    b = b / jnp.linalg.norm(b, axis=1, keepdims=True)
    angle = jnp.arctan2(b[:, 0], b[:, 1]) - jnp.arctan2(a[:, 0], a[:, 1])
    angle = angle.reshape(-1, 1)
    return (angle * 180.0 / math.pi) % 360.0


# ------------------------------- Pallas kernel -------------------------------
def _make_vae_kernel(nip, cond, latent, dec_width, out_pad_w):
    """Builds the kernel with all static widths closed over."""
    enc_in = 2 * nip + 2 * cond
    pad_w = out_pad_w - dec_width - 2 * latent

    def kernel(slab_ref, we1_ref, whh_ref, wmuls_ref, wd1_ref, wd3_ref,
               bh_ref, bmuls_ref, bd3_ref, out_ref):
        f32 = jnp.float32
        slab = slab_ref[...]                       # (tb, enc_in + latent)

        # ---- encode: one full-K matmul (we1 zero-padded over the eps lanes) ----
        h = jnp.tanh(jnp.dot(slab, we1_ref[...], preferred_element_type=f32)
                     + bh_ref[0:1, :])
        h = jnp.tanh(jnp.dot(h, whh_ref[0], preferred_element_type=f32)
                     + bh_ref[1:2, :])

        # ---- fused latent heads: one (H, 2*latent) matmul ----
        zml = (jnp.dot(h, wmuls_ref[...], preferred_element_type=f32)
               + bmuls_ref[...])
        z_mu = zml[:, :latent]                     # static lane slices (free)
        z_ls = zml[:, latent:]

        # ---- reparameterization sample ----
        eps = slab[:, enc_in:]                     # (tb, latent)
        z = z_mu + eps * jnp.exp(0.5 * z_ls)

        # ---- decoder_1 conditioning on the VPU (K = 2*cond <= 4) ----
        cond_acc = bh_ref[2:3, :]                  # (1, H), bias bd1
        for k in range(2 * cond):
            col = slab[:, 2 * nip + k: 2 * nip + k + 1]          # (tb, 1)
            wrow = wd1_ref[latent + k: latent + k + 1, :]        # (1, H)
            cond_acc = cond_acc + col * wrow                     # (tb, H)

        # ---- decode ----
        h1 = jnp.tanh(jnp.dot(z, wd1_ref[:latent, :], preferred_element_type=f32)
                      + cond_acc)
        h1 = jnp.tanh(jnp.dot(h1, whh_ref[1], preferred_element_type=f32)
                      + bh_ref[3:4, :])
        dec = (jnp.dot(h1, wd3_ref[...], preferred_element_type=f32)
               + bd3_ref[...])

        # ---- single lane-dense store: [decoded | z_mu | z_log_sigma2 | pad] ----
        pieces = [dec, zml]
        if pad_w > 0:
            pieces.append(jnp.zeros((dec.shape[0], pad_w), f32))
        out_ref[...] = jnp.concatenate(pieces, axis=1)

    return kernel


# --------------------------------- wrapper -----------------------------------
def vae_forward(params, x, eps, *, num_interm_points, condition_dimension,
                batch_tile=None):
    """x: (B, num_interm_points + 2, 2) float32. Returns (result, z_mu, z_log_sigma2)."""
    B = x.shape[0]
    nip = num_interm_points
    cond = condition_dimension

    start_raw = x[:, 0].reshape(B, -1)        # (B, 2)
    mid = x[:, 1:-1].reshape(B, -1)           # (B, 2*nip)
    goal_raw = x[:, -1].reshape(B, -1)        # (B, 2)

    if cond == 1:
        start_c = get_angle(start_raw)        # (B, 1)
        goal_c = get_angle(goal_raw)          # (B, 1)
    else:
        start_c, goal_c = start_raw, goal_raw  # (B, 2)

    latent = params["wmu"].shape[1]
    hidden = params["we2"].shape[0]
    enc_in = 2 * nip + 2 * cond
    in_w = enc_in + latent
    dec_width = 2 * nip
    out_pad_w = max(128, _round_up(dec_width + 2 * latent, 128))   # lane-dense output

    # ---- host-side packing (all fused under jit, free) ----
    # activation slab: [mid | start_c | goal_c | eps]
    slab = jnp.concatenate([mid, start_c, goal_c, eps], axis=1)    # (B, in_w)

    # we1 padded with zero rows over the eps lanes -> whole slab is the MXU LHS
    we1_aug = jnp.concatenate(
        [params["we1"], jnp.zeros((latent, hidden), jnp.float32)], axis=0)
    whh = jnp.stack([params["we2"], params["wd2"]], axis=0)        # (2, H, H)
    wmuls = jnp.concatenate([params["wmu"], params["wls"]], axis=1)  # (H, 2L)
    bmuls = jnp.concatenate([params["bmu"], params["bls"]], axis=1)  # (1, 2L)
    wd1 = params["wd1"]                                             # rows [z | start | goal]
    wd3 = params["wd3"]
    bd3 = params["bd3"]
    bh = jnp.concatenate(
        [params["be1"], params["be2"], params["bd1"], params["bd2"]], axis=0)  # (4, H)

    weights = (we1_aug, whh, wmuls, wd1, wd3, bh, bmuls, bd3)

    # ---- cdiv batch tiling: pad B, keep tile fixed, >=2 steps when possible ----
    if batch_tile is None:
        batch_tile = 2048            # sweep 1024/2048/4096/8192 per generation
    min_steps = 2 if B >= 16 else 1  # v7x: use both TensorCores when B allows
    tb = min(int(batch_tile), _round_up(pl.cdiv(B, min_steps), 8))
    tb = max(8, _round_up(tb, 8))
    tb = min(tb, 8192)
    n_steps = pl.cdiv(B, tb)
    tb = _round_up(pl.cdiv(B, n_steps), 8)   # shrink tile to minimize pad rows
    B_pad = tb * n_steps
    if B_pad > B:
        slab = jnp.concatenate(
            [slab, jnp.zeros((B_pad - B, in_w), jnp.float32)], axis=0)
    grid = (n_steps,)

    # ---- explicit VMEM budget (double-buffered in/out tiles + weights) ----
    in_w_pad = _round_up(in_w, 128)
    tile_bytes = 2 * tb * (in_w_pad + out_pad_w) * 4
    vmem_limit = int(min(max(tile_bytes + (8 << 20), 16 << 20), 48 << 20))

    vmem_full = pl.BlockSpec(memory_space=pltpu.MemorySpace.VMEM)

    kernel = _make_vae_kernel(nip, cond, latent, dec_width, out_pad_w)
    fused = pl.pallas_call(
        kernel,
        out_shape=jax.ShapeDtypeStruct((B_pad, out_pad_w), jnp.float32),
        grid=grid,
        in_specs=[pl.BlockSpec((tb, in_w), lambda i: (i, 0))]
                 + [vmem_full] * len(weights),
        out_specs=pl.BlockSpec((tb, out_pad_w), lambda i: (i, 0)),
        compiler_params=pltpu.CompilerParams(
            dimension_semantics=("parallel",),
            vmem_limit_bytes=vmem_limit),
    )(slab, *weights)

    dec = fused[:B, :dec_width]
    z_mu = fused[:B, dec_width: dec_width + latent]
    z_ls = fused[:B, dec_width + latent: dec_width + 2 * latent]

    # PyTorch: when condition_dimension == 1, start/goal revert to raw points here.
    result = jnp.concatenate([start_raw, dec, goal_raw], axis=1)
    result = result.reshape(B, nip + 2, 2)
    return result, z_mu, z_ls


# ------------------------------ parameter init --------------------------------
def _linear_params(key, fan_in, fan_out):
    # PyTorch nn.Linear default: U(-1/sqrt(fan_in), 1/sqrt(fan_in)); stored as (in, out).
    kw, kb = jax.random.split(key)
    bound = 1.0 / math.sqrt(fan_in)
    w = jax.random.uniform(kw, (fan_in, fan_out), jnp.float32, -bound, bound)
    b = jax.random.uniform(kb, (1, fan_out), jnp.float32, -bound, bound)
    return w, b


def init_vae_params(key, *, num_interm_points, condition_dimension, hidden_size, latent_dim):
    enc_in = 2 * num_interm_points + 2 * condition_dimension
    dec_in = latent_dim + 2 * condition_dimension
    keys = jax.random.split(key, 7)
    we1, be1 = _linear_params(keys[0], enc_in, hidden_size)
    we2, be2 = _linear_params(keys[1], hidden_size, hidden_size)
    wmu, bmu = _linear_params(keys[2], hidden_size, latent_dim)
    wls, bls = _linear_params(keys[3], hidden_size, latent_dim)
    wd1, bd1 = _linear_params(keys[4], dec_in, hidden_size)
    wd2, bd2 = _linear_params(keys[5], hidden_size, hidden_size)
    wd3, bd3 = _linear_params(keys[6], hidden_size, 2 * num_interm_points)
    return dict(we1=we1, be1=be1, we2=we2, be2=be2, wmu=wmu, bmu=bmu,
                wls=wls, bls=bls, wd1=wd1, bd1=bd1, wd2=wd2, bd2=bd2,
                wd3=wd3, bd3=bd3)


# -------------------------- pure-JAX reference (check) ------------------------
def _reference_forward(params, x, eps, *, num_interm_points, condition_dimension):
    B = x.shape[0]
    start_raw = x[:, 0].reshape(B, -1)
    mid = x[:, 1:-1].reshape(B, -1)
    goal_raw = x[:, -1].reshape(B, -1)
    if condition_dimension == 1:
        start_c, goal_c = get_angle(start_raw), get_angle(goal_raw)
    else:
        start_c, goal_c = start_raw, goal_raw
    x_cat = jnp.concatenate([mid, start_c, goal_c], axis=1)
    h = jnp.tanh(x_cat @ params["we1"] + params["be1"])
    h = jnp.tanh(h @ params["we2"] + params["be2"])
    z_mu = h @ params["wmu"] + params["bmu"]
    z_ls = h @ params["wls"] + params["bls"]
    z = z_mu + eps * jnp.exp(0.5 * z_ls)
    z_cat = jnp.concatenate([z, start_c, goal_c], axis=1)
    h1 = jnp.tanh(z_cat @ params["wd1"] + params["bd1"])
    h1 = jnp.tanh(h1 @ params["wd2"] + params["bd2"])
    dec = h1 @ params["wd3"] + params["bd3"]
    result = jnp.concatenate([start_raw, dec, goal_raw], axis=1)
    return result.reshape(B, num_interm_points + 2, 2), z_mu, z_ls


# ----------------------------------- main --------------------------------------
if __name__ == "__main__":
    BATCH = 8
    NUM_INTERM_POINTS = 8
    HIDDEN_SIZE = 32
    LATENT_DIM = 8

    key = jax.random.PRNGKey(0)

    for cond_dim in (2, 1):   # cond==2: raw (x,y) conditioning; cond==1: get_angle path
        k_params, k_x, k_eps, key = jax.random.split(key, 4)

        params = init_vae_params(
            k_params,
            num_interm_points=NUM_INTERM_POINTS,
            condition_dimension=cond_dim,
            hidden_size=HIDDEN_SIZE,
            latent_dim=LATENT_DIM,
        )

        # trajectory: (B, nip + 2, 2) points, scaled to keep tanh well-conditioned
        x = jax.random.uniform(k_x, (BATCH, NUM_INTERM_POINTS + 2, 2),
                               jnp.float32, 0.0, 1.0)
        # epsilon for the reparameterization trick (torch.randn_like equivalent)
        eps = jax.random.normal(k_eps, (BATCH, LATENT_DIM), jnp.float32)

        fwd = jax.jit(functools.partial(
            vae_forward,
            num_interm_points=NUM_INTERM_POINTS,
            condition_dimension=cond_dim,
        ))
        result, z_mu, z_log_sigma2 = fwd(params, x, eps)
        jax.block_until_ready((result, z_mu, z_log_sigma2))

        r_ref, mu_ref, ls_ref = _reference_forward(
            params, x, eps,
            num_interm_points=NUM_INTERM_POINTS,
            condition_dimension=cond_dim,
        )
        assert result.shape == (BATCH, NUM_INTERM_POINTS + 2, 2)
        assert z_mu.shape == (BATCH, LATENT_DIM)
        assert z_log_sigma2.shape == (BATCH, LATENT_DIM)
        assert jnp.allclose(result, r_ref, rtol=2e-3, atol=2e-3)
        assert jnp.allclose(z_mu, mu_ref, rtol=2e-3, atol=2e-3)
        assert jnp.allclose(z_log_sigma2, ls_ref, rtol=2e-3, atol=2e-3)

    print("KERNEL_OK")
</pallas_src>

<mosaic_0001>
module attributes {stable_mosaic.version = 11 : i64} {
  func.func @kernel(%arg0: i32, %arg1: memref<8x28xf32, #tpu.memory_space<vmem>>, %arg2: memref<28x32xf32, #tpu.memory_space<vmem>>, %arg3: memref<2x32x32xf32, #tpu.memory_space<vmem>>, %arg4: memref<32x16xf32, #tpu.memory_space<vmem>>, %arg5: memref<12x32xf32, #tpu.memory_space<vmem>>, %arg6: memref<32x16xf32, #tpu.memory_space<vmem>>, %arg7: memref<4x32xf32, #tpu.memory_space<vmem>>, %arg8: memref<1x16xf32, #tpu.memory_space<vmem>>, %arg9: memref<1x16xf32, #tpu.memory_space<vmem>>, %arg10: memref<8x128xf32, #tpu.memory_space<vmem>>) attributes {dimension_semantics = [#tpu.dimension_semantics<parallel>], iteration_bounds = array<i64: 1>, scalar_prefetch = 0 : i64, scratch_operands = 0 : i64, tpu.core_type = #tpu.core_type<tc>, window_params = [{transform_indices = @transform_0, window_bounds = array<i64: 8, 28>}, {pipeline_mode = #tpu.pipeline_mode<synchronous>, transform_indices = @transform_1, window_bounds = array<i64: 28, 32>}, {pipeline_mode = #tpu.pipeline_mode<synchronous>, transform_indices = @transform_2, window_bounds = array<i64: 2, 32, 32>}, {pipeline_mode = #tpu.pipeline_mode<synchronous>, transform_indices = @transform_3, window_bounds = array<i64: 32, 16>}, {pipeline_mode = #tpu.pipeline_mode<synchronous>, transform_indices = @transform_4, window_bounds = array<i64: 12, 32>}, {pipeline_mode = #tpu.pipeline_mode<synchronous>, transform_indices = @transform_5, window_bounds = array<i64: 32, 16>}, {pipeline_mode = #tpu.pipeline_mode<synchronous>, transform_indices = @transform_6, window_bounds = array<i64: 4, 32>}, {pipeline_mode = #tpu.pipeline_mode<synchronous>, transform_indices = @transform_7, window_bounds = array<i64: 1, 16>}, {pipeline_mode = #tpu.pipeline_mode<synchronous>, transform_indices = @transform_8, window_bounds = array<i64: 1, 16>}, {transform_indices = @transform_9, window_bounds = array<i64: 8, 128>}]} {
    %c0 = arith.constant 0 : index
    %c0_0 = arith.constant 0 : index
    %0 = vector.load %arg1[%c0, %c0_0] : memref<8x28xf32, #tpu.memory_space<vmem>>, vector<8x28xf32>
    %c0_1 = arith.constant 0 : index
    %c0_2 = arith.constant 0 : index
    %1 = vector.load %arg2[%c0_1, %c0_2] : memref<28x32xf32, #tpu.memory_space<vmem>>, vector<28x32xf32>
    %cst = arith.constant dense<0.000000e+00> : vector<8x32xf32>
    %2 = tpu.matmul %0, %1, %cst {dimension_numbers = #tpu.dot_dimension_numbers<[1], [0], [0], [1], [0, 0, 1, 1], [], []>} : vector<8x28xf32>, vector<28x32xf32>, vector<8x32xf32> -> vector<8x32xf32>
    %c0_3 = arith.constant 0 : index
    %c0_4 = arith.constant 0 : index
    %3 = vector.load %arg7[%c0_3, %c0_4] : memref<4x32xf32, #tpu.memory_space<vmem>>, vector<1x32xf32>
    %4 = vector.broadcast %3 : vector<1x32xf32> to vector<8x32xf32>
    %5 = arith.addf %2, %4 : vector<8x32xf32>
    %6 = math.tanh %5 : vector<8x32xf32>
    %c0_5 = arith.constant 0 : index
    %c0_6 = arith.constant 0 : index
    %c0_7 = arith.constant 0 : index
    %7 = vector.load %arg3[%c0_5, %c0_6, %c0_7] : memref<2x32x32xf32, #tpu.memory_space<vmem>>, vector<1x32x32xf32>
    %8 = vector.shape_cast %7 : vector<1x32x32xf32> to vector<32x32xf32>
    %cst_8 = arith.constant dense<0.000000e+00> : vector<8x32xf32>
    %9 = tpu.matmul %6, %8, %cst_8 {dimension_numbers = #tpu.dot_dimension_numbers<[1], [0], [0], [1], [0, 0, 1, 1], [], []>} : vector<8x32xf32>, vector<32x32xf32>, vector<8x32xf32> -> vector<8x32xf32>
    %c1 = arith.constant 1 : index
    %c0_9 = arith.constant 0 : index
    %10 = vector.load %arg7[%c1, %c0_9] : memref<4x32xf32, #tpu.memory_space<vmem>>, vector<1x32xf32>
    %11 = vector.broadcast %10 : vector<1x32xf32> to vector<8x32xf32>
    %12 = arith.addf %9, %11 : vector<8x32xf32>
    %13 = math.tanh %12 : vector<8x32xf32>
    %c0_10 = arith.constant 0 : index
    %c0_11 = arith.constant 0 : index
    %14 = vector.load %arg4[%c0_10, %c0_11] : memref<32x16xf32, #tpu.memory_space<vmem>>, vector<32x16xf32>
    %cst_12 = arith.constant dense<0.000000e+00> : vector<8x16xf32>
    %15 = tpu.matmul %13, %14, %cst_12 {dimension_numbers = #tpu.dot_dimension_numbers<[1], [0], [0], [1], [0, 0, 1, 1], [], []>} : vector<8x32xf32>, vector<32x16xf32>, vector<8x16xf32> -> vector<8x16xf32>
    %c0_13 = arith.constant 0 : index
    %c0_14 = arith.constant 0 : index
    %16 = vector.load %arg8[%c0_13, %c0_14] : memref<1x16xf32, #tpu.memory_space<vmem>>, vector<1x16xf32>
    %17 = vector.broadcast %16 : vector<1x16xf32> to vector<8x16xf32>
    %18 = arith.addf %15, %17 : vector<8x16xf32>
    %19 = vector.extract_strided_slice %18 {offsets = [0, 0], sizes = [8, 8], strides = [1, 1]} : vector<8x16xf32> to vector<8x8xf32>
    %20 = vector.extract_strided_slice %18 {offsets = [0, 8], sizes = [8, 8], strides = [1, 1]} : vector<8x16xf32> to vector<8x8xf32>
    %21 = vector.extract_strided_slice %0 {offsets = [0, 20], sizes = [8, 8], strides = [1, 1]} : vector<8x28xf32> to vector<8x8xf32>
    %cst_15 = arith.constant 5.000000e-01 : f32
    %22 = vector.broadcast %cst_15 : f32 to vector<8x8xf32>
    %23 = arith.mulf %22, %20 : vector<8x8xf32>
    %24 = math.exp %23 : vector<8x8xf32>
    %25 = arith.mulf %21, %24 : vector<8x8xf32>
    %26 = arith.addf %19, %25 : vector<8x8xf32>
    %c2 = arith.constant 2 : index
    %c0_16 = arith.constant 0 : index
    %27 = vector.load %arg7[%c2, %c0_16] : memref<4x32xf32, #tpu.memory_space<vmem>>, vector<1x32xf32>
    %28 = vector.extract_strided_slice %0 {offsets = [0, 16], sizes = [8, 1], strides = [1, 1]} : vector<8x28xf32> to vector<8x1xf32>
    %c8 = arith.constant 8 : index
    %c0_17 = arith.constant 0 : index
    %29 = vector.load %arg5[%c8, %c0_17] : memref<12x32xf32, #tpu.memory_space<vmem>>, vector<1x32xf32>
    %30 = vector.broadcast %28 : vector<8x1xf32> to vector<8x32xf32>
    %31 = vector.broadcast %29 : vector<1x32xf32> to vector<8x32xf32>
    %32 = arith.mulf %30, %31 : vector<8x32xf32>
    %33 = vector.broadcast %27 : vector<1x32xf32> to vector<8x32xf32>
    %34 = arith.addf %33, %32 : vector<8x32xf32>
    %35 = vector.extract_strided_slice %0 {offsets = [0, 17], sizes = [8, 1], strides = [1, 1]} : vector<8x28xf32> to vector<8x1xf32>
    %c9 = arith.constant 9 : index
    %c0_18 = arith.constant 0 : index
    %36 = vector.load %arg5[%c9, %c0_18] : memref<12x32xf32, #tpu.memory_space<vmem>>, vector<1x32xf32>
    %37 = vector.broadcast %35 : vector<8x1xf32> to vector<8x32xf32>
    %38 = vector.broadcast %36 : vector<1x32xf32> to vector<8x32xf32>
    %39 = arith.mulf %37, %38 : vector<8x32xf32>
    %40 = arith.addf %34, %39 : vector<8x32xf32>
    %41 = vector.extract_strided_slice %0 {offsets = [0, 18], sizes = [8, 1], strides = [1, 1]} : vector<8x28xf32> to vector<8x1xf32>
    %c10 = arith.constant 10 : index
    %c0_19 = arith.constant 0 : index
    %42 = vector.load %arg5[%c10, %c0_19] : memref<12x32xf32, #tpu.memory_space<vmem>>, vector<1x32xf32>
    %43 = vector.broadcast %41 : vector<8x1xf32> to vector<8x32xf32>
    %44 = vector.broadcast %42 : vector<1x32xf32> to vector<8x32xf32>
    %45 = arith.mulf %43, %44 : vector<8x32xf32>
    %46 = arith.addf %40, %45 : vector<8x32xf32>
    %47 = vector.extract_strided_slice %0 {offsets = [0, 19], sizes = [8, 1], strides = [1, 1]} : vector<8x28xf32> to vector<8x1xf32>
    %c11 = arith.constant 11 : index
    %c0_20 = arith.constant 0 : index
    %48 = vector.load %arg5[%c11, %c0_20] : memref<12x32xf32, #tpu.memory_space<vmem>>, vector<1x32xf32>
    %49 = vector.broadcast %47 : vector<8x1xf32> to vector<8x32xf32>
    %50 = vector.broadcast %48 : vector<1x32xf32> to vector<8x32xf32>
    %51 = arith.mulf %49, %50 : vector<8x32xf32>
    %52 = arith.addf %46, %51 : vector<8x32xf32>
    %c0_21 = arith.constant 0 : index
    %c0_22 = arith.constant 0 : index
    %53 = vector.load %arg5[%c0_21, %c0_22] : memref<12x32xf32, #tpu.memory_space<vmem>>, vector<8x32xf32>
    %cst_23 = arith.constant dense<0.000000e+00> : vector<8x32xf32>
    %54 = tpu.matmul %26, %53, %cst_23 {dimension_numbers = #tpu.dot_dimension_numbers<[1], [0], [0], [1], [0, 0, 1, 1], [], []>} : vector<8x8xf32>, vector<8x32xf32>, vector<8x32xf32> -> vector<8x32xf32>
    %55 = arith.addf %54, %52 : vector<8x32xf32>
    %56 = math.tanh %55 : vector<8x32xf32>
    %c1_24 = arith.constant 1 : index
    %c0_25 = arith.constant 0 : index
    %c0_26 = arith.constant 0 : index
    %57 = vector.load %arg3[%c1_24, %c0_25, %c0_26] : memref<2x32x32xf32, #tpu.memory_space<vmem>>, vector<1x32x32xf32>
    %58 = vector.shape_cast %57 : vector<1x32x32xf32> to vector<32x32xf32>
    %cst_27 = arith.constant dense<0.000000e+00> : vector<8x32xf32>
    %59 = tpu.matmul %56, %58, %cst_27 {dimension_numbers = #tpu.dot_dimension_numbers<[1], [0], [0], [1], [0, 0, 1, 1], [], []>} : vector<8x32xf32>, vector<32x32xf32>, vector<8x32xf32> -> vector<8x32xf32>
    %c3 = arith.constant 3 : index
    %c0_28 = arith.constant 0 : index
    %60 = vector.load %arg7[%c3, %c0_28] : memref<4x32xf32, #tpu.memory_space<vmem>>, vector<1x32xf32>
    %61 = vector.broadcast %60 : vector<1x32xf32> to vector<8x32xf32>
    %62 = arith.addf %59, %61 : vector<8x32xf32>
    %63 = math.tanh %62 : vector<8x32xf32>
    %c0_29 = arith.constant 0 : index
    %c0_30 = arith.constant 0 : index
    %64 = vector.load %arg6[%c0_29, %c0_30] : memref<32x16xf32, #tpu.memory_space<vmem>>, vector<32x16xf32>
    %cst_31 = arith.constant dense<0.000000e+00> : vector<8x16xf32>
    %65 = tpu.matmul %63, %64, %cst_31 {dimension_numbers = #tpu.dot_dimension_numbers<[1], [0], [0], [1], [0, 0, 1, 1], [], []>} : vector<8x32xf32>, vector<32x16xf32>, vector<8x16xf32> -> vector<8x16xf32>
    %c0_32 = arith.constant 0 : index
    %c0_33 = arith.constant 0 : index
    %66 = vector.load %arg9[%c0_32, %c0_33] : memref<1x16xf32, #tpu.memory_space<vmem>>, vector<1x16xf32>
    %67 = vector.broadcast %66 : vector<1x16xf32> to vector<8x16xf32>
    %68 = arith.addf %65, %67 : vector<8x16xf32>
    %cst_34 = arith.constant 0.000000e+00 : f32
    %69 = vector.broadcast %cst_34 : f32 to vector<8x96xf32>
    %70 = tpu.concatenate %68, %18, %69 in 1 : vector<8x16xf32>, vector<8x16xf32>, vector<8x96xf32> -> vector<8x128xf32>
    %c0_35 = arith.constant 0 : index
    %c0_36 = arith.constant 0 : index
    %71 = vector.load %arg10[%c0_35, %c0_36] : memref<8x128xf32, #tpu.memory_space<vmem>>, vector<8x128xf32>
    tpu.vector_store %arg10[%c0_35, %c0_36], %70 {strides = array<i32>} : memref<8x128xf32, #tpu.memory_space<vmem>>, vector<8x128xf32>,
    return
  }
  func.func @transform_0(%arg0: i32) -> (i32, i32) {
    %c0_i32 = arith.constant 0 : i32
    %c0_i32_0 = arith.constant 0 : i32
    return %arg0, %c0_i32 : i32, i32
  }
  func.func @transform_1(%arg0: i32) -> (i32, i32) {
    %c0_i32 = arith.constant 0 : i32
    %c0_i32_0 = arith.constant 0 : i32
    %c0_i32_1 = arith.constant 0 : i32
    return %c0_i32, %c0_i32_0 : i32, i32
  }
  func.func @transform_2(%arg0: i32) -> (i32, i32, i32) {
    %c0_i32 = arith.constant 0 : i32
    %c0_i32_0 = arith.constant 0 : i32
    %c0_i32_1 = arith.constant 0 : i32
    %c0_i32_2 = arith.constant 0 : i32
    return %c0_i32, %c0_i32_0, %c0_i32_1 : i32, i32, i32
  }
  func.func @transform_3(%arg0: i32) -> (i32, i32) {
    %c0_i32 = arith.constant 0 : i32
    %c0_i32_0 = arith.constant 0 : i32
    %c0_i32_1 = arith.constant 0 : i32
    return %c0_i32, %c0_i32_0 : i32, i32
  }
  func.func @transform_4(%arg0: i32) -> (i32, i32) {
    %c0_i32 = arith.constant 0 : i32
    %c0_i32_0 = arith.constant 0 : i32
    %c0_i32_1 = arith.constant 0 : i32
    return %c0_i32, %c0_i32_0 : i32, i32
  }
  func.func @transform_5(%arg0: i32) -> (i32, i32) {
    %c0_i32 = arith.constant 0 : i32
    %c0_i32_0 = arith.constant 0 : i32
    %c0_i32_1 = arith.constant 0 : i32
    return %c0_i32, %c0_i32_0 : i32, i32
  }
  func.func @transform_6(%arg0: i32) -> (i32, i32) {
    %c0_i32 = arith.constant 0 : i32
    %c0_i32_0 = arith.constant 0 : i32
    %c0_i32_1 = arith.constant 0 : i32
    return %c0_i32, %c0_i32_0 : i32, i32
  }
  func.func @transform_7(%arg0: i32) -> (i32, i32) {
    %c0_i32 = arith.constant 0 : i32
    %c0_i32_0 = arith.constant 0 : i32
    %c0_i32_1 = arith.constant 0 : i32
    return %c0_i32, %c0_i32_0 : i32, i32
  }
  func.func @transform_8(%arg0: i32) -> (i32, i32) {
    %c0_i32 = arith.constant 0 : i32
    %c0_i32_0 = arith.constant 0 : i32
    %c0_i32_1 = arith.constant 0 : i32
    return %c0_i32, %c0_i32_0 : i32, i32
  }
  func.func @transform_9(%arg0: i32) -> (i32, i32) {
    %c0_i32 = arith.constant 0 : i32
    %c0_i32_0 = arith.constant 0 : i32
    return %arg0, %c0_i32 : i32, i32
  }
}

</mosaic_0001>

<bundles_post_ra>
// kernel: vae_forward.1
= control target key start
LH: loop header
LB: loop body
LE: loop exit
PB: predicated region body
PF: predicated region fallthrough
CT: control target
= control target key end

     0   :  { %v772_v0 = vmov 0.0|0.0   ;;  %vm46_vm0 = vcmask 1043456   ;;  %vm773_vm1 = vmmov 0   ;;  %v774_v6 = vmov 0.0   ;;  %s779_s17 = smov 16   ;;  %s780_s19 = smov 12   ;;  %s968_s1 = inlined_call_operand.vmem [shape: f32[28,32], index: 1, kind: input, shape index: {}]   ;;  %s969_s0 = inlined_call_operand.vmem [shape: f32[8,28], index: 0, kind: input, shape index: {}]   ;;  %s970_s2 = inlined_call_operand.vmem [shape: f32[2,32,32], index: 2, kind: input, shape index: {}]   ;;  %s971_s6 = inlined_call_operand.vmem [shape: f32[4,32], index: 6, kind: input, shape index: {}]   ;;  %s972_s3 = inlined_call_operand.vmem [shape: f32[32,16], index: 3, kind: input, shape index: {}]   ;;  %s973_s7 = inlined_call_operand.vmem [shape: f32[1,16], index: 7, kind: input, shape index: {}]   ;;  %s974_s4 = inlined_call_operand.vmem [shape: f32[12,32], index: 4, kind: input, shape index: {}]   ;;  %s975_s5 = inlined_call_operand.vmem [shape: f32[32,16], index: 5, kind: input, shape index: {}]   ;;  %s976_s8 = inlined_call_operand.vmem [shape: f32[1,16], index: 8, kind: input, shape index: {}]   ;;  %s977_s9 = inlined_call_operand.vmem [shape: f32[8,128], index: 9, kind: output, shape index: {}]  }
   0x1   :  { %715 = vmatprep.subr.bf16.mxu0 %v772_v0  ;;  %v33_v1 = vld [vmem:[%s968_s1] sm:$0xff]  ;;  %v34_v2 = vld [vmem:[%s968_s1 + $0x8] sm:$0xff]  ;;  %v35_v3 = vld [vmem:[%s968_s1 + $0x10] sm:$0xff]  ;;  %722 = vmatprep.subr.bf16.mxu1 %v772_v0  ;;  %vm775_vm2 = vmmov 1   ;;  %vm42_vm4 = vcmask 228352   ;;  %vm130_vm5 = vcmask 261120  }
   0x2   :  { %v716_v4 = vpack.c.bf16 %v34_v2, %v33_v1  ;;  %v36_v5 = vld [vmem:[%s968_s1 + $0x18] sm:$0xf]  ;;  %663 = vmatprep.mubr.msk.f32.mxu0 %vm773_vm1, %v774_v6  ;;  %674 = vmatprep.mubr.msk.f32.mxu1 %vm773_vm1, %v774_v6  ;;  %vm720_vm3 = vmpackc.low %vm46_vm0, %vm775_vm2  ;;  %v855_v8 = vld [vmem:[%s969_s0] sm:$0xff]  ;;  %v776_v26 = vmov 16   ;;  %v777_v27 = vmov 17   ;;  %v778_v28 = vmov 19  }
   0x3   :  { %v719_v7 = vpack.c.bf16 %v36_v5, %v35_v3  ;;  %v121_v9 = vld [vmem:[%s970_s2] sm:$0xff]  ;;  %v122_v10 = vld [vmem:[%s970_s2 + $0x8] sm:$0xff]  ;;  %v123_v11 = vld [vmem:[%s970_s2 + $0x10] sm:$0xff]  ;;  %757 = vset.pattern.permute.xlu1 %v776_v26  ;;  %v781_v42 = vmov 18   ;;  %vm352_vm6 = vcmask 64512   ;;  %vm599_vm7 = vcmask 130048  }
   0x4   :  { %717 = vmatpush3.bf16.msra.mxu0 %v716_v4  ;;  %v723_v12 = vpack.c.bf16 %v122_v10, %v121_v9  ;;  %v124_v13 = vld [vmem:[%s970_s2 + $0x18] sm:$0xff]  ;;  %v607_v15 = vld [vmem:[%s971_s6] ss:$0 sm:$0xff]  ;;  %v206_v21 = vld [vmem:[%s972_s3 + $0x8] sm:$0xff]  ;;  %305 = vperm.xlu1 %757, %v855_v8  }
   0x5   :  { %718 = vmatprep.subr.bf16.mxu0 %v772_v0  ;;  %v726_v14 = vpack.c.bf16 %v124_v13, %v123_v11  ;;  %v205_v20 = vld [vmem:[%s972_s3] sm:$0xff]  ;;  %v207_v22 = vld [vmem:[%s972_s3 + $0x10] sm:$0xff]  ;;  %v208_v24 = vld [vmem:[%s972_s3 + $0x18] sm:$0xff]  ;;  %759 = vset.pattern.permute.xlu0 %v781_v42 }
   0x6   :  { %724 = vmatpush3.bf16.msra.mxu1 %v723_v12  ;;  %v729_v23 = vpack.c.bf16 %v206_v21, %v205_v20  ;;  %v732_v25 = vpack.c.bf16 %v208_v24, %v207_v22  ;;  %v610_v29 = vld [vmem:[%s971_s6 + $0x1] ss:$0 sm:$0xff]  ;;  %v612_v34 = vld [vmem:[%s973_s7] ss:$0 sm:$0xff]  ;;  %s782_s7 = smov 108   ;;  %v621_v48 = vld [vmem:[%s970_s2 + $0x28] sm:$0xff] }
   0x7   :  { %725 = vmatprep.subr.bf16.mxu1 %v772_v0  ;;  %v351_v40 = vld [vmem:[%s974_s4] sm:$0xff]  ;;  %v622_v49 = vld [vmem:[%s970_s2 + $0x30] sm:$0xff]  ;;  %v623_v51 = vld [vmem:[%s970_s2 + $0x38] sm:$0xff] }
   0x8   :  { %721 = vmatpush3.bf16.msk.msra.mxu0 %vm720_vm3, %v719_v7  ;;  %758 = vset.pattern.permute.xlu1 %v777_v27  ;;  %v620_v47 = vld [vmem:[%s970_s2 + $0x20] sm:$0xff]  ;;  %v738_v52 = vpack.c.bf16 %v623_v51, %v622_v49  ;;  %v614_v53 = vld [vmem:[%s974_s4 + $0x8] ss:$0 sm:$0xff]  ;;  %v616_v57 = vld [vmem:[%s974_s4 + $0x9] ss:$0 sm:$0xff] }
   0x9   :  { %728 = vmatprep.subr.bf16.mxu0 %v772_v0  ;;  %320 = vperm.xlu1 %758, %v855_v8   ;;  %v735_v50 = vpack.c.bf16 %v621_v48, %v620_v47  ;;  %v615_v56 = vld [vmem:[%s971_s6 + $0x2] ss:$0 sm:$0xff]  ;;  %v617_v61 = vld [vmem:[%s974_s4 + $0xa] ss:$0 sm:$0xff]  ;;  %v618_v2 = vld [vmem:[%s974_s4 + $0xb] ss:$0 sm:$0xff] }
   0xa   :  { %727 = vmatpush3.bf16.msra.mxu1 %v726_v14  ;;  %v511_v11 = vld [vmem:[%s975_s5] sm:$0xff]  ;;  %v512_v12 = vld [vmem:[%s975_s5 + $0x8] sm:$0xff]  ;;  %v513_v13 = vld [vmem:[%s975_s5 + $0x10] sm:$0xff] }
   0xb   :  { %664 = vmatmul.mubr.msk.f32.vlgmr.msra.gmra.mrb[0].mxu0 %vm42_vm4, %v855_v8  ;;  %688 = vmatprep.subr.mxu1 %v774_v6  ;;  %v741_v14 = vpack.c.bf16 %v512_v12, %v511_v11  ;;  %v626_v22 = vld [vmem:[%s976_s8] ss:$0 sm:$0xff] }
   0xc   :  { %685 = vmatprep.mubr.msk.f32.mxu0 %vm773_vm1, %v774_v6  ;;  %730 = vmatpush3.bf16.msra.mxu0 %v729_v23 }
   0xd   :  { %731 = vmatprep.subr.bf16.mxu0 %v772_v0  ;;  %760 = vset.pattern.permute.xlu1 %v778_v28 }
   0xe   :  { %342 = vperm.xlu1 %760, %v855_v8  }
  0x10   :  { %733 = vmatpush3.bf16.msra.mxu0 %v732_v25 }
  0x11   :  { %740 = vmatprep.subr.bf16.mxu0 %v772_v0 }
  0x83   :  { %v306_v54 = vpop.permute.xlu1 %305 }
  0x84   :  { %v312_v55 = vmul.f32 %v614_v53, %v306_v54 }
  0x86   :  { %v317_v59 = vadd.f32 %v615_v56, %v312_v55 }
  0x88   :  { %v321_v58 = vpop.permute.xlu1 %320 }
  0x89   :  { %v327_v60 = vmul.f32 %v616_v57, %v321_v58 }
  0x8b   :  { %v328_v63 = vadd.f32 %v327_v60, %v317_v59 }
  0x8d   :  { %v343_v3 = vpop.permute.xlu1 %342 }
  0x8e   :  { %v349_v4 = vmul.f32 %v618_v2, %v343_v3 }
  0xde   :  { %v116_v16 = vpop.f32.mrb[0].mxu0 }
  0xdf   :  { %v117_v17 = vadd.f32 %v607_v15, %v116_v16  ;;  %v665_v18 = vpop.f32.mrb[1].mxu0  ;;  %v514_v15 = vld [vmem:[%s975_s5 + $0x18] sm:$0xff] }
  0xe0   :  { %v744_v16 = vpack.c.bf16 %v514_v15, %v513_v13 }
  0xe1   :  { %762 = vtanh.f32 %v117_v17  ;;  %v624_v17 = vld [vmem:[%s971_s6 + $0x3] ss:$0 sm:$0xff] }
  0xeb   :  { %v763_v19 = vpop.eup %762 }
  0xec   :  { %675 = vmatmul.mubr.msk.f32.vlgmr.msra.gmra.mrb[0].mxu1 %vm130_vm5, %v763_v19 }
  0xed   :  { %690 = vmatprep.mubr.msk.f32.mxu1 %vm773_vm1, %v774_v6  ;;  %689 = vmatpush3.msra.mxu1 %v351_v40 }
  0xee   :  { %734 = vmatprep.subr.bf16.mxu1 %v772_v0 }
 0x1bf   :  { %v200_v30 = vpop.f32.mrb[0].mxu1 }
 0x1c0   :  { %v201_v31 = vadd.f32 %v610_v29, %v200_v30  ;;  %v676_v32 = vpop.f32.mrb[1].mxu1 }
 0x1c2   :  { %764 = vtanh.f32 %v201_v31 }
 0x1cc   :  { %v765_v33 = vpop.eup %764 }
 0x1cd   :  { %686 = vmatmul.mubr.msk.f32.vlgmr.msra.gmra.mrb[2].mxu0 %vm130_vm5, %v765_v33 }
 0x1ce   :  { %712 = vmatprep.mubr.msk.f32.mxu0 %vm773_vm1, %v774_v6  ;;  %742 = vmatpush3.bf16.msra.mxu0 %v741_v14 }
 0x1cf   :  { %743 = vmatprep.subr.bf16.mxu0 %v772_v0 }
 0x1d2   :  { %745 = vmatpush3.bf16.msra.mxu0 %v744_v16 }
 0x2a0   :  { %v285_v35 = vpop.f32.mrb[2].mxu0 }
 0x2a1   :  { %v286_v36 = vadd.f32 %v612_v34, %v285_v35  ;;  %v687_v37 = vpop.f32.mrb[3].mxu0 }
 0x2a3   :  { %v289_v38 = vmul.f32 0.5, %v286_v36  ;;  %596 = vrot.lane.b32.xlu1 %v286_v36, %s779_s17 }
 0x2a5   :  { %v290_v39 = vmul.f32 1.442695, %v289_v38 }
 0x2a7   :  { %766 = vpow2.f32 %v290_v39 }
 0x2b1   :  { %v767_v41 = vpop.eup %766 }
 0x2b2   :  { %293 = vrot.lane.b32.xlu0 %v767_v41, %s780_s19 }
 0x315   :  { %v597_v25 = vpop.permute.xlu1 %596 }
 0x324   :  { %v294_v43 = vpop.permute.xlu0 %293 }
 0x325   :  { %v296_v44 = vmul.f32 %v294_v43, %v855_v8 }
 0x327   :  { %298 = vrot.lane.b32.xlu0 %v296_v44, %s782_s7 }
 0x32b   :  { %331 = vperm.xlu0 %759, %v855_v8  }
 0x32f   :  { %761 = vset.pattern.permute.xlu0 %v778_v28 }
 0x399   :  { %v299_v45 = vpop.permute.xlu0 %298 }
 0x39a   :  { %v301_v46 = vadd.f32 %v299_v45, %v286_v36 }
 0x39c   :  { %691 = vmatmul.mubr.msk.f32.vlgmr.msra.gmra.mrb[2].mxu1 %vm352_vm6, %v301_v46 }
 0x39d   :  { %701 = vmatprep.mubr.msk.f32.mxu1 %vm773_vm1, %v774_v6  ;;  %736 = vmatpush3.bf16.msra.mxu1 %v735_v50 }
 0x39e   :  { %737 = vmatprep.subr.bf16.mxu1 %v772_v0 }
 0x3a1   :  { %739 = vmatpush3.bf16.msra.mxu1 %v738_v52 }
 0x3aa   :  { %v332_v62 = vpop.permute.xlu0 %331 }
 0x3ab   :  { %v338_v1 = vmul.f32 %v617_v61, %v332_v62 }
 0x3ad   :  { %v339_v5 = vadd.f32 %v338_v1, %v328_v63 }
 0x3af   :  { %v350_v6 = vadd.f32 %v349_v4, %v339_v5 }
 0x46f   :  { %v422_v7 = vpop.f32.mrb[2].mxu1 }
 0x470   :  { %v423_v8 = vadd.f32 %v422_v7, %v350_v6  ;;  %v692_v9 = vpop.f32.mrb[3].mxu1 }
 0x472   :  { %768 = vtanh.f32 %v423_v8 }
 0x47c   :  { %v769_v10 = vpop.eup %768 }
 0x47d   :  { %702 = vmatmul.mubr.msk.f32.vlgmr.msra.gmra.mrb[4].mxu1 %vm130_vm5, %v769_v10 }
 0x550   :  { %v506_v18 = vpop.f32.mrb[4].mxu1 }
 0x551   :  { %v507_v19 = vadd.f32 %v624_v17, %v506_v18  ;;  %v703_v20 = vpop.f32.mrb[5].mxu1 }
 0x553   :  { %770 = vtanh.f32 %v507_v19 }
 0x55d   :  { %v771_v21 = vpop.eup %770 }
 0x55e   :  { %713 = vmatmul.mubr.msk.f32.vlgmr.msra.gmra.mrb[4].mxu0 %vm130_vm5, %v771_v21 }
 0x631   :  { %v591_v23 = vpop.f32.mrb[4].mxu0 }
 0x632   :  { %v592_v24 = vadd.f32 %v626_v22, %v591_v23  ;;  %v714_v0 = vpop.f32.mrb[5].mxu0 }
 0x634   :  { %v600_v26 = vsel %vm599_vm7, %v592_v24, %v597_v25 }
 0x635   :  { %v601_v27 = vsel %vm130_vm5, %v600_v26, 0.0 }
 0x636   :  { %602 = vst [vmem:[%s977_s9] sm:$0xff] %v601_v27 }

</bundles_post_ra>
